<compile_context>
chip_gen: v5e
topology: v5e:2x2
jax: 0.10.0
libtpu: 0.0.40
codegen_flags: <defaults>
</compile_context>

<pallas_src>
import functools

import jax
import jax.numpy as jnp
from jax.experimental import pallas as pl
from jax.experimental.pallas import tpu as pltpu


# ---------------------------------------------------------------------------
# Pallas kernel: transfer (conv+BN+relu) -> 1 residual block -> max over S
# ---------------------------------------------------------------------------
def _pre_extraction_kernel(x_ref, wt_ref, bt_ref, w1_ref, b1_ref, w2_ref,
                           b2_ref, o_ref, *, gp_blk, s, dp, cp, chunk_gp):
    # x_ref: [gp_blk, S, Dp] f32 (pack groups interleaved along the lane dim)
    # wt_ref: [Dp, Cp] bf16 (block-diag)   w1/w2: [Cp, Cp] bf16 (block-diag)
    # biases: [1, Cp] f32                  o_ref: [gp_blk, Cp] f32
    n_chunks = gp_blk // chunk_gp

    # Hoist grid-invariant weight/bias loads out of the chunk loop
    # (JAX does not CSE these; re-issuing them per chunk wastes vld slots).
    wt = wt_ref[...]
    w1 = w1_ref[...]
    w2 = w2_ref[...]
    bt = bt_ref[...]
    b1 = b1_ref[...]
    b2 = b2_ref[...]

    @pl.loop(0, n_chunks)  # no unroll: keep the per-chunk live set in-vreg
    def _(ci):
        g0 = pl.multiple_of(ci * chunk_gp, chunk_gp)
        xs = x_ref[pl.ds(g0, chunk_gp), :, :]             # [chunk_gp, S, Dp] f32
        xs = xs.reshape(chunk_gp * s, dp).astype(jnp.bfloat16)

        # transfer = Conv1d(k=1) + BN + ReLU (BN folded into wt/bt)
        h = jnp.dot(xs, wt, preferred_element_type=jnp.float32)
        h = jnp.maximum(h + bt, 0.0)                      # [rows, Cp] f32

        # ConvBNReLURes1D (groups=1, res_expansion=1)
        h1 = jnp.dot(h.astype(jnp.bfloat16), w1,
                     preferred_element_type=jnp.float32)
        h1 = jnp.maximum(h1 + b1, 0.0)                    # net1
        h2 = jnp.dot(h1.astype(jnp.bfloat16), w2,
                     preferred_element_type=jnp.float32)
        h3 = jnp.maximum(h2 + b2 + h, 0.0)                # act(net2(net1(x)) + x)

        # adaptive_max_pool1d(x, 1): max over S; rows are already lane-dense
        # packed output rows, and chunk_gp % 8 == 0 -> full-tile unmasked vst.
        pooled = jnp.max(h3.reshape(chunk_gp, s, cp), axis=1)
        o_ref[pl.ds(g0, chunk_gp), :] = pooled


# ---------------------------------------------------------------------------
# Tiling heuristics
# ---------------------------------------------------------------------------
def _choose_group_block(gp, s, *, target_rows=4096, min_grid=2):
    """Largest multiple-of-8 divisor of gp with ~target_rows matmul rows per
    block, keeping >= min_grid grid steps when possible (v7x: 2 TensorCores;
    v5e/v6e are single-TC so fewer, larger steps are fine)."""
    row_cap = max(8, target_rows // max(s, 1))
    grid_cap = max(1, gp // min_grid) if gp >= min_grid else gp
    cap = min(row_cap, grid_cap)
    divs8 = [blk for blk in range(8, gp + 1, 8) if gp % blk == 0]
    in_cap = [blk for blk in divs8 if blk <= cap]
    if in_cap:
        return in_cap[-1]
    if divs8:
        return divs8[0]
    return gp


def _choose_chunk_groups(gp_blk, s, *, target_rows=128):
    """Packed groups per in-kernel chunk: multiple of 8 (full (8,128) output
    stores), divides gp_blk, ~target_rows MXU rows (vreg-budget friendly)."""
    cap = max(8, target_rows // max(s, 1))
    best = None
    for cg in range(8, gp_blk + 1, 8):
        if gp_blk % cg == 0 and cg <= cap:
            best = cg
    if best is not None:
        return best
    # Fallback: smallest multiple-of-8 divisor (keeps full-tile stores even if
    # the chunk is bigger than the vreg target); else no chunking.
    for cg in range(8, gp_blk + 1, 8):
        if gp_blk % cg == 0:
            return cg
    return gp_blk


# ---------------------------------------------------------------------------
# Wrapper
# ---------------------------------------------------------------------------
def pre_extraction_pallas(x, wt, bt, w1, b1, w2, b2, *, group_block=None):
    """x: [b, n, s, d] float32 -> [b, out_channels, n] float32."""
    b, n, s, d = x.shape
    c = wt.shape[1]
    g = b * n

    # Lane-pack `pack` consecutive groups into the channel dim so the whole
    # compute path is 128-lane dense.  (On v6e/v7x packing to 256 lanes would
    # match the wider MXU; 128 kept here for portability incl. v5e.)
    pack = 1
    if c < 128 and 128 % c == 0 and g % (128 // c) == 0:
        pack = 128 // c
    gp = g // pack
    dp = pack * d
    cp = pack * c

    if group_block is None:
        group_block = _choose_group_block(gp, s)
    assert gp % group_block == 0, "packed group count must divide into blocks"
    chunk_gp = _choose_chunk_groups(group_block, s)

    # x stays f32 (cast to bf16 inside the kernel); interleave pack groups
    # along the channel/lane dim in the wrapper.
    if pack > 1:
        xg = x.reshape(gp, pack, s, d).transpose(0, 2, 1, 3).reshape(gp, s, dp)
    else:
        xg = x.reshape(g, s, d)

    # Block-diagonal folded weights (bf16) + lane-tiled biases (f32).
    eye = jnp.eye(pack, dtype=jnp.float32)
    wt_bd = jnp.kron(eye, wt).astype(jnp.bfloat16)     # [Dp, Cp]
    w1_bd = jnp.kron(eye, w1).astype(jnp.bfloat16)     # [Cp, Cp]
    w2_bd = jnp.kron(eye, w2).astype(jnp.bfloat16)     # [Cp, Cp]
    bt_p = jnp.tile(bt, (1, pack))
    b1_p = jnp.tile(b1, (1, pack))
    b2_p = jnp.tile(b2, (1, pack))

    # VMEM budget with PADDED footprints (lane dim pads to 128); x/out are
    # double-buffered by the pipeline, grid-invariant weights counted once.
    pad8 = lambda v: -(-v // 8) * 8
    pad128 = lambda v: -(-v // 128) * 128
    x_blk = group_block * pad8(s) * pad128(dp) * 4                 # f32
    o_blk = pad8(group_block) * pad128(cp) * 4
    w_blk = (pad8(dp) + 2 * pad8(cp)) * pad128(cp) * 2 \
        + 3 * pad8(1) * pad128(cp) * 4
    est = 2 * (x_blk + o_blk) + w_blk + (8 << 20)                  # + headroom
    vmem_limit = int(min(48 << 20, max(32 << 20, est)))            # >v5e default,
                                                                   # <v7x physical

    kernel = functools.partial(_pre_extraction_kernel, gp_blk=group_block,
                               s=s, dp=dp, cp=cp, chunk_gp=chunk_gp)

    pooled = pl.pallas_call(
        kernel,
        out_shape=jax.ShapeDtypeStruct((gp, cp), jnp.float32),
        grid_spec=pltpu.PrefetchScalarGridSpec(
            num_scalar_prefetch=0,
            grid=(gp // group_block,),
            in_specs=[
                pl.BlockSpec((group_block, s, dp), lambda i: (i, 0, 0)),
                pl.BlockSpec((dp, cp), lambda i: (0, 0)),
                pl.BlockSpec((1, cp), lambda i: (0, 0)),
                pl.BlockSpec((cp, cp), lambda i: (0, 0)),
                pl.BlockSpec((1, cp), lambda i: (0, 0)),
                pl.BlockSpec((cp, cp), lambda i: (0, 0)),
                pl.BlockSpec((1, cp), lambda i: (0, 0)),
            ],
            out_specs=pl.BlockSpec((group_block, cp), lambda i: (i, 0)),
        ),
        compiler_params=pltpu.CompilerParams(
            dimension_semantics=("parallel",),
            vmem_limit_bytes=vmem_limit),
    )(xg, wt_bd, bt_p, w1_bd, b1_p, w2_bd, b2_p)

    # [gp, pack*C] -> [G, C] -> [b, n, C] -> [b, C, n]
    return pooled.reshape(g, c).reshape(b, n, c).transpose(0, 2, 1)


# ---------------------------------------------------------------------------
# Parameter construction (deterministic) + BN folding (eval-mode)
# ---------------------------------------------------------------------------
def _fold_conv_bn(w, b_conv, gamma, beta, mean, var, eps=1e-5):
    # w: [C_out, C_in] (k=1 conv) -> (W_folded^T [C_in, C_out], bias [1, C_out])
    a = gamma / jnp.sqrt(var + eps)
    wf = w * a[:, None]
    bf = (b_conv - mean) * a + beta
    return wf.T.astype(jnp.float32), bf[None, :].astype(jnp.float32)


def make_params(key, in_channels, out_channels):
    keys = jax.random.split(key, 12)
    c_in, c = in_channels, out_channels

    def conv_bn(kw, kb, kg, kbt, ci, co):
        w = 0.1 * jax.random.normal(kw, (co, ci), jnp.float32)
        b = 0.05 * jax.random.normal(kb, (co,), jnp.float32)
        gamma = 1.0 + 0.1 * jax.random.normal(kg, (co,), jnp.float32)
        beta = 0.05 * jax.random.normal(kbt, (co,), jnp.float32)
        mean = jnp.zeros((co,), jnp.float32)      # running stats at init
        var = jnp.ones((co,), jnp.float32)
        return _fold_conv_bn(w, b, gamma, beta, mean, var)

    wt, bt = conv_bn(keys[0], keys[1], keys[2], keys[3], c_in, c)   # transfer
    w1, b1 = conv_bn(keys[4], keys[5], keys[6], keys[7], c, c)      # block net1
    w2, b2 = conv_bn(keys[8], keys[9], keys[10], keys[11], c, c)    # block net2
    return wt, bt, w1, b1, w2, b2


# ---------------------------------------------------------------------------
# Pure-JAX reference (same folded-BN semantics and bf16-input matmul policy)
# ---------------------------------------------------------------------------
def pre_extraction_ref(x, wt, bt, w1, b1, w2, b2):
    b, n, s, d = x.shape
    xg = x.reshape(b * n, s, d).astype(jnp.bfloat16)
    wt_b, w1_b, w2_b = (w.astype(jnp.bfloat16) for w in (wt, w1, w2))
    h = jax.nn.relu(jnp.einsum('gsd,dc->gsc', xg, wt_b,
                               preferred_element_type=jnp.float32) + bt)
    h1 = jax.nn.relu(jnp.einsum('gsc,ce->gse', h.astype(jnp.bfloat16), w1_b,
                                preferred_element_type=jnp.float32) + b1)
    h2 = jnp.einsum('gse,ec->gsc', h1.astype(jnp.bfloat16), w2_b,
                    preferred_element_type=jnp.float32) + b2
    h3 = jax.nn.relu(h2 + h)
    pooled = jnp.max(h3, axis=1)
    return pooled.reshape(b, n, -1).transpose(0, 2, 1)


if __name__ == "__main__":
    # channels=4, use_xyz=True -> in_channels = 3 + 2*4 = 11
    b, n, s = 2, 64, 16
    channels, out_channels = 4, 32
    in_channels = 3 + 2 * channels  # 11

    key = jax.random.PRNGKey(0)
    kx, kp = jax.random.split(key)
    x = jax.random.normal(kx, (b, n, s, in_channels), jnp.float32)
    params = make_params(kp, in_channels, out_channels)

    out = pre_extraction_pallas(x, *params)
    out = jax.block_until_ready(out)

    ref = pre_extraction_ref(x, *params)
    assert out.shape == (b, out_channels, n), out.shape
    assert jnp.allclose(out, ref, atol=2e-3, rtol=2e-3), \
        float(jnp.max(jnp.abs(out - ref)))

    print("KERNEL_OK")
</pallas_src>

<mosaic_0001>
module attributes {stable_mosaic.version = 11 : i64} {
  func.func @_pre_extraction_kernel(%arg0: i32, %arg1: memref<16x16x44xf32, #tpu.memory_space<vmem>>, %arg2: memref<44x128xbf16, #tpu.memory_space<vmem>>, %arg3: memref<1x128xf32, #tpu.memory_space<vmem>>, %arg4: memref<128x128xbf16, #tpu.memory_space<vmem>>, %arg5: memref<1x128xf32, #tpu.memory_space<vmem>>, %arg6: memref<128x128xbf16, #tpu.memory_space<vmem>>, %arg7: memref<1x128xf32, #tpu.memory_space<vmem>>, %arg8: memref<16x128xf32, #tpu.memory_space<vmem>>) attributes {dimension_semantics = [#tpu.dimension_semantics<parallel>], iteration_bounds = array<i64: 2>, scalar_prefetch = 0 : i64, scratch_operands = 0 : i64, tpu.core_type = #tpu.core_type<tc>, window_params = [{transform_indices = @transform_0, window_bounds = array<i64: 16, 16, 44>}, {pipeline_mode = #tpu.pipeline_mode<synchronous>, transform_indices = @transform_1, window_bounds = array<i64: 44, 128>}, {pipeline_mode = #tpu.pipeline_mode<synchronous>, transform_indices = @transform_2, window_bounds = array<i64: 1, 128>}, {pipeline_mode = #tpu.pipeline_mode<synchronous>, transform_indices = @transform_3, window_bounds = array<i64: 128, 128>}, {pipeline_mode = #tpu.pipeline_mode<synchronous>, transform_indices = @transform_4, window_bounds = array<i64: 1, 128>}, {pipeline_mode = #tpu.pipeline_mode<synchronous>, transform_indices = @transform_5, window_bounds = array<i64: 128, 128>}, {pipeline_mode = #tpu.pipeline_mode<synchronous>, transform_indices = @transform_6, window_bounds = array<i64: 1, 128>}, {transform_indices = @transform_7, window_bounds = array<i64: 16, 128>}]} {
    %c0 = arith.constant 0 : index
    %c0_0 = arith.constant 0 : index
    %0 = vector.load %arg2[%c0, %c0_0] : memref<44x128xbf16, #tpu.memory_space<vmem>>, vector<44x128xbf16>
    %c0_1 = arith.constant 0 : index
    %c0_2 = arith.constant 0 : index
    %1 = vector.load %arg4[%c0_1, %c0_2] : memref<128x128xbf16, #tpu.memory_space<vmem>>, vector<128x128xbf16>
    %c0_3 = arith.constant 0 : index
    %c0_4 = arith.constant 0 : index
    %2 = vector.load %arg6[%c0_3, %c0_4] : memref<128x128xbf16, #tpu.memory_space<vmem>>, vector<128x128xbf16>
    %c0_5 = arith.constant 0 : index
    %c0_6 = arith.constant 0 : index
    %3 = vector.load %arg3[%c0_5, %c0_6] : memref<1x128xf32, #tpu.memory_space<vmem>>, vector<1x128xf32>
    %c0_7 = arith.constant 0 : index
    %c0_8 = arith.constant 0 : index
    %4 = vector.load %arg5[%c0_7, %c0_8] : memref<1x128xf32, #tpu.memory_space<vmem>>, vector<1x128xf32>
    %c0_9 = arith.constant 0 : index
    %c0_10 = arith.constant 0 : index
    %5 = vector.load %arg7[%c0_9, %c0_10] : memref<1x128xf32, #tpu.memory_space<vmem>>, vector<1x128xf32>
    %c0_i32 = arith.constant 0 : i32
    %c2_i32 = arith.constant 2 : i32
    %6 = arith.addi %c0_i32, %c2_i32 : i32
    %c1_i32 = arith.constant 1 : i32
    scf.for %arg9 = %c0_i32 to %6 step %c1_i32  : i32 {
      %c1_i32_12 = arith.constant 1 : i32
      %7 = arith.muli %arg9, %c1_i32_12 : i32
      %c0_i32_13 = arith.constant 0 : i32
      %8 = arith.addi %c0_i32_13, %7 : i32
      %c8_i32 = arith.constant 8 : i32
      %9 = arith.muli %8, %c8_i32 : i32
      %10 = tpu.assume_multiple %9, 8 : i32
      %11 = arith.index_cast %10 : i32 to index
      %c0_14 = arith.constant 0 : index
      %c0_15 = arith.constant 0 : index
      %12 = vector.load %arg1[%11, %c0_14, %c0_15] : memref<16x16x44xf32, #tpu.memory_space<vmem>>, vector<8x16x44xf32>
      %13 = vector.shape_cast %12 : vector<8x16x44xf32> to vector<128x44xf32>
      %14 = arith.truncf %13 : vector<128x44xf32> to vector<128x44xbf16>
      %cst = arith.constant dense<0.000000e+00> : vector<128x128xf32>
      %15 = tpu.matmul %14, %0, %cst {dimension_numbers = #tpu.dot_dimension_numbers<[1], [0], [0], [1], [0, 0, 1, 1], [], []>} : vector<128x44xbf16>, vector<44x128xbf16>, vector<128x128xf32> -> vector<128x128xf32>
      %16 = vector.broadcast %3 : vector<1x128xf32> to vector<128x128xf32>
      %17 = arith.addf %15, %16 : vector<128x128xf32>
      %cst_16 = arith.constant 0.000000e+00 : f32
      %18 = vector.broadcast %cst_16 : f32 to vector<128x128xf32>
      %19 = arith.maximumf %17, %18 : vector<128x128xf32>
      %20 = arith.truncf %19 : vector<128x128xf32> to vector<128x128xbf16>
      %cst_17 = arith.constant dense<0.000000e+00> : vector<128x128xf32>
      %21 = tpu.matmul %20, %1, %cst_17 {dimension_numbers = #tpu.dot_dimension_numbers<[1], [0], [0], [1], [0, 0, 1, 1], [], []>} : vector<128x128xbf16>, vector<128x128xbf16>, vector<128x128xf32> -> vector<128x128xf32>
      %22 = vector.broadcast %4 : vector<1x128xf32> to vector<128x128xf32>
      %23 = arith.addf %21, %22 : vector<128x128xf32>
      %cst_18 = arith.constant 0.000000e+00 : f32
      %24 = vector.broadcast %cst_18 : f32 to vector<128x128xf32>
      %25 = arith.maximumf %23, %24 : vector<128x128xf32>
      %26 = arith.truncf %25 : vector<128x128xf32> to vector<128x128xbf16>
      %cst_19 = arith.constant dense<0.000000e+00> : vector<128x128xf32>
      %27 = tpu.matmul %26, %2, %cst_19 {dimension_numbers = #tpu.dot_dimension_numbers<[1], [0], [0], [1], [0, 0, 1, 1], [], []>} : vector<128x128xbf16>, vector<128x128xbf16>, vector<128x128xf32> -> vector<128x128xf32>
      %28 = vector.broadcast %5 : vector<1x128xf32> to vector<128x128xf32>
      %29 = arith.addf %27, %28 : vector<128x128xf32>
      %30 = arith.addf %29, %19 : vector<128x128xf32>
      %cst_20 = arith.constant 0.000000e+00 : f32
      %31 = vector.broadcast %cst_20 : f32 to vector<128x128xf32>
      %32 = arith.maximumf %30, %31 : vector<128x128xf32>
      %33 = vector.shape_cast %32 : vector<128x128xf32> to vector<8x16x128xf32>
      %cst_21 = arith.constant dense<0xFF800000> : vector<8x128xf32>
      %34 = vector.multi_reduction <maximumf>, %33, %cst_21 [1] : vector<8x16x128xf32> to vector<8x128xf32>
      %35 = arith.index_cast %10 : i32 to index
      %c0_22 = arith.constant 0 : index
      %36 = vector.load %arg8[%35, %c0_22] : memref<16x128xf32, #tpu.memory_space<vmem>>, vector<8x128xf32>
      tpu.vector_store %arg8[%35, %c0_22], %34 {strides = array<i32>} : memref<16x128xf32, #tpu.memory_space<vmem>>, vector<8x128xf32>,
    }
    %c2_i32_11 = arith.constant 2 : i32
    return
  }
  func.func @transform_0(%arg0: i32) -> (i32, i32, i32) {
    %c0_i32 = arith.constant 0 : i32
    %c0_i32_0 = arith.constant 0 : i32
    %c0_i32_1 = arith.constant 0 : i32
    return %arg0, %c0_i32, %c0_i32_0 : i32, i32, i32
  }
  func.func @transform_1(%arg0: i32) -> (i32, i32) {
    %c0_i32 = arith.constant 0 : i32
    %c0_i32_0 = arith.constant 0 : i32
    %c0_i32_1 = arith.constant 0 : i32
    return %c0_i32, %c0_i32_0 : i32, i32
  }
  func.func @transform_2(%arg0: i32) -> (i32, i32) {
    %c0_i32 = arith.constant 0 : i32
    %c0_i32_0 = arith.constant 0 : i32
    %c0_i32_1 = arith.constant 0 : i32
    return %c0_i32, %c0_i32_0 : i32, i32
  }
  func.func @transform_3(%arg0: i32) -> (i32, i32) {
    %c0_i32 = arith.constant 0 : i32
    %c0_i32_0 = arith.constant 0 : i32
    %c0_i32_1 = arith.constant 0 : i32
    return %c0_i32, %c0_i32_0 : i32, i32
  }
  func.func @transform_4(%arg0: i32) -> (i32, i32) {
    %c0_i32 = arith.constant 0 : i32
    %c0_i32_0 = arith.constant 0 : i32
    %c0_i32_1 = arith.constant 0 : i32
    return %c0_i32, %c0_i32_0 : i32, i32
  }
  func.func @transform_5(%arg0: i32) -> (i32, i32) {
    %c0_i32 = arith.constant 0 : i32
    %c0_i32_0 = arith.constant 0 : i32
    %c0_i32_1 = arith.constant 0 : i32
    return %c0_i32, %c0_i32_0 : i32, i32
  }
  func.func @transform_6(%arg0: i32) -> (i32, i32) {
    %c0_i32 = arith.constant 0 : i32
    %c0_i32_0 = arith.constant 0 : i32
    %c0_i32_1 = arith.constant 0 : i32
    return %c0_i32, %c0_i32_0 : i32, i32
  }
  func.func @transform_7(%arg0: i32) -> (i32, i32) {
    %c0_i32 = arith.constant 0 : i32
    %c0_i32_0 = arith.constant 0 : i32
    return %arg0, %c0_i32 : i32, i32
  }
}

</mosaic_0001>

<bundles_post_ra>
// kernel: tpu_custom_call.1
= control target key start
LH: loop header
LB: loop body
LE: loop exit
PB: predicated region body
PF: predicated region fallthrough
CT: control target
= control target key end

     0   :  { %s1992_s0 = inlined_call_operand.hbm [shape: f32[32,16,44], index: 0, kind: input, shape index: {}]   ;;  %s1993_s1 = inlined_call_operand.hbm [shape: bf16[44,128], index: 1, kind: input, shape index: {}]   ;;  %s1994_s2 = inlined_call_operand.vmem [shape: f32[1,128], index: 2, kind: input, shape index: {}]   ;;  %s1995_s3 = inlined_call_operand.hbm [shape: bf16[128,128], index: 3, kind: input, shape index: {}]   ;;  %s1996_s4 = inlined_call_operand.vmem [shape: f32[1,128], index: 4, kind: input, shape index: {}]   ;;  %s1997_s5 = inlined_call_operand.hbm [shape: bf16[128,128], index: 5, kind: input, shape index: {}]   ;;  %s1998_s6 = inlined_call_operand.vmem [shape: f32[1,128], index: 6, kind: input, shape index: {}]   ;;  %s1999_s7 = inlined_call_operand.hbm [shape: f32[32,128], index: 7, kind: output, shape index: {}]  }
   0x1   :  { %2016 = sst [smem:[#allocation29_spill]] %s1993_s1 }
   0x2   :  { %12 = vsyncpa [#allocation3], 0 }
   0x3   :  { %14 = vsyncpa [#allocation3 + $0x1], 0 }
   0x4   :  { %15 = vsyncpa [#allocation6], 0 }
   0x5   :  { %16 = vsyncpa [#allocation9], 0 }
   0x6   :  { %17 = vsyncpa [#allocation4], 0 }
   0x7   :  { %19 = vsyncpa [#allocation4 + $0x1], 0  ;;  %s1503_s24 = smov 0   ;;  %s1505_s25 = smov 0  }
   0x8   :  { %s1507_s26 = smov 0   ;;  %s1509_s27 = smov 0  }
   0x9 LB: > { %s1524_s28 = sadd.s32 4294967295, %s1448_s27   ;;  %s1013_s29 = sadd.s32 4294967294, %s1448_s27   ;;  %s1448_s27 = sphi %s1509_s27, %s2072_s27   ;;  %s1444_s26 = sphi %s1507_s26, %s2071_s26   ;;  %s1440_s25 = sphi %s1505_s25, %s2070_s25   ;;  %s1436_s24 = sphi %s1503_s24, %s2069_s24  }
   0xa   : > { %p45_p0 = scmp.ne.s32.totalorder %s1440_s25, %s1436_s24  ;;  %p46_p1 = scmp.eq.s32.totalorder %s1524_s28, 0 }
   0xb   : > { %p195_p2 = scmp.eq.s32.totalorder %s1524_s28, 1  ;;  %p201_p3 = scmp.eq.s32.totalorder %s1013_s29, 1 }
   0xc   : > { %p1533_p4 = por %p46_p1, %p45_p0  ;;  %p1014_p5 = scmp.ge.s32.totalorder %s1448_s27, 1 }
   0xd   : > { %p1538_p6 = por %p201_p3, %p45_p0  ;;  %p208_p7 = scmp.lt.s32.totalorder %s1448_s27, 3 }
   0xe   : > { %s2019_s1 = sld [smem:[#allocation29_spill]]  ;;  %s1454_s13 = smov [#allocation5]  }
   0xf   : > { %p1546_p8 = pnand %p1014_p5, %p208_p7  ;;  %s221_s14 = sshll.u32 %s1454_s13, 4  ;;  %s222_s14 = int_to_ptr.vmem [resolvable:$true] %s221_s14 }
  0x10   : > { %s236_s18 = sshll.u32 %s1995_s3, 4  ;;  %s1455_s19 = smov 64   ;;  %s237_s18 = int_to_ptr.hbm [resolvable:$true] %s236_s18 }
  0x11   : > { %p1175_p9 = pneg %p1546_p8  ;;  %s1456_s20 = smov 4  }
  0x12   : > { %s1457_s21 = smov [#allocation7]   ;;  %s253_s9 = sshll.u32 %s1997_s5, 4  ;;  %s254_s9 = int_to_ptr.hbm [resolvable:$true] %s253_s9 }
  0x13   : > { %p1554_p10 = pnand %p1175_p9, %p46_p1  ;;  %s238_s22 = sshll.u32 %s1457_s21, 4  ;;  %s239_s22 = int_to_ptr.vmem [resolvable:$true] %s238_s22 }
  0x14   : > { %s219_s11 = sshll.u32 %s2019_s1, 4  ;;  %s1458_s10 = smov [#allocation8]   ;;  %s220_s11 = int_to_ptr.hbm [resolvable:$true] %s219_s11 }
  0x15   : > { %1178 = dma.hbm_to_vmem [thread:$0]  (!%p1554_p10), %s220_s11, 384, %s222_s14, [#allocation6], %s1455_s19, %s1455_s19, %s1456_s20  }
  0x16   : > { %1181 = dma.hbm_to_vmem [thread:$0]  (!%p1554_p10), %s237_s18, 1024, %s239_s22, [#allocation6], %s1455_s19, %s1455_s19, %s1456_s20  }
  0x17   : > { %s255_s13 = sshll.u32 %s1458_s10, 4  ;;  %s1570_s11 = sadd.s32 1, %s1448_s27   ;;  %s256_s13 = int_to_ptr.vmem [resolvable:$true] %s255_s13 }
  0x18   : > { %1184 = dma.hbm_to_vmem [thread:$0]  (!%p1554_p10), %s254_s9, 1024, %s256_s13, [#allocation9], %s1455_s19, %s1455_s19, %s1456_s20  }
  0x19   : > { %s29_s14 = ssub.s32 %s1448_s27, %s1570_s11  ;;  %s32_s16 = sadd.s32 1, %s1444_s26 }
  0x1a   : > { %p30_p12 = scmp.eq.s32.totalorder %s29_s14, 0  ;;  %p39_p13 = scmp.ne.s32.totalorder %s1444_s26, %s1440_s25 }
  0x1b   : > { %p40_p0 = scmp.eq.s32.totalorder %s1448_s27, 0  ;;  %p1196_p3 = scmp.lt.s32.totalorder %s1448_s27, 2 }
  0x1c   : > { %s1582_s17 = scalar_select %p30_p12, %s1444_s26, %s32_s16  }
  0x1d   : > { %p41_p5 = por %p40_p0, %p39_p13  ;;  %p1586_p7 = por %p195_p2, %p39_p13 }
  0x1e   : > { %s272_s21 = sand.u32 1, %s1444_s26   ;;  %s1121_s22 = sshll.u32 %s1448_s27, 8 }
  0x1f   : > { %s1019_s15 = sshll.u32 %s272_s21, 8  ;;  %s282_s20 = scalar_lea.hbm %s1992_s0, %s1121_s22 }
  0x20   : > { %s283_s29 = sshll.u32 %s282_s20, 4  ;;  %s276_s9 = scalar_lea.vmem [#allocation2], %s1019_s15  ;;  %s284_s29 = int_to_ptr.hbm [resolvable:$true] %s283_s29 }
  0x21   : > { %s285_s10 = sshll.u32 %s276_s9, 4  ;;  %p1597_p9 = pnand %p1196_p3, %p41_p5  ;;  %s286_s10 = int_to_ptr.vmem [resolvable:$true] %s285_s10 }
  0x22   : > { %s273_s14 = scalar_lea.sflag [#allocation3], %s272_s21  ;;  %s1340_s16 = sshra.s32 %s284_s29, 4  ;;  %s1341_s16 = int_to_ptr.hbm [resolvable:$true] %s1340_s16 }
  0x23   : > { %s1342_s1 = scalar_lea.hbm %s1341_s16, 256  ;;  %p1344_p10 = pneg %p1597_p9 }
  0x24   : > { %p1343_p2 = scmp.ne.s32.totalorder %s1341_s16, %s1342_s1  ;;  %s1347_s23 = scalar_lea.hbm %s1992_s0, 512 }
  0x25   : > { %p1348_p0 = scmp.lt.s32.totalorder %s1341_s16, %s1992_s0  ;;  %p1349_p3 = scmp.lt.s32.totalorder %s1347_s23, %s1342_s1 }
  0x26   : > { %p1345_p12 = pnand %p1344_p10, %p1343_p2 }
  0x27   : > { %p1350_p5 = por %p1349_p3, %p1348_p0 }
  0x28   : > { %p1346_p13 = pneg %p1345_p12 }
  0x2a   : > { %p1351_p11 = pnand %p1350_p5, %p1346_p13 }
  0x2c   : > { %1354 = shalt.err (!%p1351_p11)
}
  0x2d   : > { %s1459_s21 = smov 128   ;;  %s1460_s9 = smov 8  }
  0x2e   : > { %1188 = dma.hbm_to_vmem [thread:$0]  (!%p1597_p9), %s284_s29, 4096, %s286_s10, %s273_s14, %s1459_s21, %s1459_s21, %s1460_s9  }
  0x2f   : > { %297 = sbr.rel (%p1546_p8) target bundleno = 659 (0x293), region = 48 }
  0x34   : > { %s1614_s22 = sand.u32 1, %s1440_s25  }
  0x35   : > { %s1024_s15 = sshll.u32 %s1614_s22, 8  ;;  %s300_s16 = scalar_lea.sflag [#allocation3], %s1614_s22 }
  0x36   : > { %s1618_s1 = scalar_lea.vmem [#allocation2], %s1024_s15 }
  0x37   : > { %1419 = dma.done.wait (%p1533_p4), %s300_s16, 4096  }
  0x38   : > { %1421 = vsyncadd (%p1533_p4), %s300_s16, 4294963200 }
  0x39   : > { %1423 = dma.done.wait (%p46_p1), [#allocation6], 1408  }
  0x3a   : > { %1425 = vsyncadd (%p46_p1), [#allocation6], 4294965888 }
  0x3b   : > { %1427 = dma.done.wait (%p46_p1), [#allocation9], 1024  }
  0x3c   : > { %1429 = vsyncadd (%p46_p1), [#allocation9], 4294966272  ;;  %s1028_s12 = sshll.u32 %s1614_s22, 4  ;;  %v1633_v0 = vld [vmem:[#allocation5] sm:$0xf]  ;;  %s1728_s20 = smov 0  }
  0x3d   : > { %2024 = vst [vmem:[#allocation15_spill] sm:$0xff] %v1633_v0  ;;  %v1635_v1 = vld [vmem:[#allocation5] sm:$0xf0]  ;;  %v1637_v2 = vld [vmem:[#allocation5 + $0x8] sm:$0xf]  ;;  %s1726_s19 = scalar_lea.vmem [#allocation10], %s1028_s12 }
  0x3e   : > { %2025 = vst [vmem:[#allocation16_spill] sm:$0xff] %v1635_v1  ;;  %v1639_v3 = vld [vmem:[#allocation5 + $0x8] sm:$0xf0]  ;;  %v1641_v4 = vld [vmem:[#allocation5 + $0x10] sm:$0xf] }
  0x3f   : > { %2026 = vst [vmem:[#allocation17_spill] sm:$0xff] %v1637_v2  ;;  %v1643_v5 = vld [vmem:[#allocation5 + $0x10] sm:$0x30]  ;;  %v1645_v6 = vld [vmem:[#allocation7] sm:$0xf] }
  0x40   : > { %2027 = vst [vmem:[#allocation18_spill] sm:$0xff] %v1639_v3  ;;  %v1647_v7 = vld [vmem:[#allocation7] sm:$0xf0]  ;;  %v1649_v8 = vld [vmem:[#allocation7 + $0x8] sm:$0xf] }
  0x41   : > { %2028 = vst [vmem:[#allocation19_spill] sm:$0xff] %v1641_v4  ;;  %v1651_v9 = vld [vmem:[#allocation7 + $0x8] sm:$0xf0]  ;;  %v1653_v10 = vld [vmem:[#allocation7 + $0x10] sm:$0xf] }
  0x42   : > { %2029 = vst [vmem:[#allocation20_spill] sm:$0xff] %v1643_v5  ;;  %v1655_v11 = vld [vmem:[#allocation7 + $0x10] sm:$0xf0]  ;;  %v1657_v12 = vld [vmem:[#allocation7 + $0x18] sm:$0xf] }
  0x43   : > { %2030 = vst [vmem:[#allocation21_spill] sm:$0xff] %v1645_v6  ;;  %v1659_v13 = vld [vmem:[#allocation7 + $0x18] sm:$0xf0]  ;;  %v1661_v14 = vld [vmem:[#allocation7 + $0x20] sm:$0xf] }
  0x44   : > { %2031 = vst [vmem:[#allocation22_spill] sm:$0xff] %v1647_v7  ;;  %v1663_v15 = vld [vmem:[#allocation7 + $0x20] sm:$0xf0]  ;;  %v1665_v16 = vld [vmem:[#allocation7 + $0x28] sm:$0xf] }
  0x45   : > { %2032 = vst [vmem:[#allocation23_spill] sm:$0xff] %v1649_v8  ;;  %v1667_v17 = vld [vmem:[#allocation7 + $0x28] sm:$0xf0]  ;;  %v1669_v18 = vld [vmem:[#allocation7 + $0x30] sm:$0xf] }
  0x46   : > { %2033 = vst [vmem:[#allocation24_spill] sm:$0xff] %v1651_v9  ;;  %v1671_v19 = vld [vmem:[#allocation7 + $0x30] sm:$0xf0]  ;;  %v1673_v20 = vld [vmem:[#allocation7 + $0x38] sm:$0xf] }
  0x47   : > { %2034 = vst [vmem:[#allocation25_spill] sm:$0xff] %v1653_v10  ;;  %v1675_v21 = vld [vmem:[#allocation7 + $0x38] sm:$0xf0]  ;;  %v1677_v22 = vld [vmem:[#allocation8] sm:$0xf] }
  0x48   : > { %2035 = vst [vmem:[#allocation26_spill] sm:$0xff] %v1655_v11  ;;  %v1679_v23 = vld [vmem:[#allocation8] sm:$0xf0]  ;;  %v1681_v24 = vld [vmem:[#allocation8 + $0x8] sm:$0xf] }
  0x49   : > { %2036 = vst [vmem:[#allocation27_spill] sm:$0xff] %v1657_v12  ;;  %v1683_v25 = vld [vmem:[#allocation8 + $0x8] sm:$0xf0]  ;;  %v1685_v26 = vld [vmem:[#allocation8 + $0x10] sm:$0xf] }
  0x4a   : > { %2037 = vst [vmem:[#allocation28_spill] sm:$0xff] %v1659_v13  ;;  %v1687_v27 = vld [vmem:[#allocation8 + $0x10] sm:$0xf0]  ;;  %v1689_v28 = vld [vmem:[#allocation8 + $0x18] sm:$0xf] }
  0x4b   : > { %v1691_v29 = vld [vmem:[#allocation8 + $0x18] sm:$0xf0]  ;;  %v1693_v30 = vld [vmem:[#allocation8 + $0x20] sm:$0xf]  ;;  %v1695_v31 = vld [vmem:[#allocation8 + $0x20] sm:$0xf0] }
  0x4c   : > { %v1697_v32 = vld [vmem:[#allocation8 + $0x28] sm:$0xf]  ;;  %v1699_v33 = vld [vmem:[#allocation8 + $0x28] sm:$0xf0]  ;;  %v1701_v34 = vld [vmem:[#allocation8 + $0x30] sm:$0xf] }
  0x4d   : > { %v1703_v35 = vld [vmem:[#allocation8 + $0x30] sm:$0xf0]  ;;  %v1705_v36 = vld [vmem:[#allocation8 + $0x38] sm:$0xf]  ;;  %v1707_v37 = vld [vmem:[#allocation8 + $0x38] sm:$0xf0] }
  0x4e   : > { %v1712_v38 = vld [vmem:[%s1994_s2] sm:$0x1] }
  0x4f   : > { %v1717_v39 = vld [vmem:[%s1996_s4] sm:$0x1] }
  0x50   : > { %v1722_v40 = vld [vmem:[%s1998_s6] sm:$0x1] }
  0x51 LB: >> { %v2038_v4 = vld [vmem:[#allocation19_spill] sm:$0xff]  ;;  %v2039_v5 = vld [vmem:[#allocation20_spill] sm:$0xff]  ;;  %vm472_vm0 = vcmask 1045504   ;;  %s1141_s21 = sshll.u32 %s1452_s20, 7  ;;  %v2040_v2 = vld [vmem:[#allocation17_spill] sm:$0xff]  ;;  %vm447_vm1 = vcmask 359424   ;;  %v1082_v60 = vor.u32 %v1675_v21, %v1673_v20  ;;  %s1452_s20 = sphi %s1728_s20, %s399_s20  }
  0x52   : >> { %v1042_v41 = vor.u32 %v2039_v5, %v2038_v4  ;;  %v2041_v3 = vld [vmem:[#allocation18_spill] sm:$0xff]  ;;  %s1739_s9 = scalar_lea.vmem %s1618_s1, %s1141_s21 [#allocation2]  ;;  %v2042_v0 = vld [vmem:[#allocation15_spill] sm:$0xff]  ;;  %v2043_v1 = vld [vmem:[#allocation16_spill] sm:$0xff]  ;;  %vm869_vm2 = vcmask 1041409   ;;  %vm871_vm3 = vcmask 1042434   ;;  %vm873_vm4 = vcmask 1043459  }
  0x53   : >> { %v1038_v43 = vor.u32 %v2041_v3, %v2040_v2  ;;  %v1034_v44 = vor.u32 %v2043_v1, %v2042_v0  ;;  %v403_v45 = vld [vmem:[%s1739_s9] sm:$0xff]  ;;  %v404_v46 = vld [vmem:[%s1739_s9 + $0x8] sm:$0xff]  ;;  %v405_v48 = vld [vmem:[%s1739_s9 + $0x10] sm:$0xff]  ;;  %600 = vmatpush.bf16.msra.mxu1 %v1082_v60  ;;  %1143 = vmatpush.bf16.msra.mxu3 %v1082_v60  ;;  %vm875_vm5 = vcmask 1044484   ;;  %vm877_vm6 = vcmask 1045509   ;;  %s1029_s15 = sshll.u32 %s1452_s20, 3 }
  0x54   : >> { %v474_v42 = vsel %vm472_vm0, %v1042_v41, 0  ;;  %v419_v47 = vpack.c.bf16 %v404_v46, %v403_v45  ;;  %v406_v49 = vld [vmem:[%s1739_s9 + $0x18] sm:$0xff]  ;;  %v407_v51 = vld [vmem:[%s1739_s9 + $0x20] sm:$0xff]  ;;  %v408_v52 = vld [vmem:[%s1739_s9 + $0x28] sm:$0xff]  ;;  %v1078_v41 = vor.u32 %v1671_v19, %v1669_v18  ;;  %vm879_vm7 = vcmask 1046534   ;;  %s884_s16 = scalar_lea.vmem %s1726_s19, %s1029_s15 [#allocation10]  ;;  %s399_s20 = sadd.s32 1, %s1452_s20  }
  0x55   : >> { %481 = vmatpush.bf16.msra.mxu0 %v474_v42  ;;  %v420_v50 = vpack.c.bf16 %v406_v49, %v405_v48  ;;  %v421_v53 = vpack.c.bf16 %v408_v52, %v407_v51  ;;  %v409_v54 = vld [vmem:[%s1739_s9 + $0x30] sm:$0xff]  ;;  %v410_v55 = vld [vmem:[%s1739_s9 + $0x38] sm:$0xff]  ;;  %v411_v57 = vld [vmem:[%s1739_s9 + $0x40] sm:$0xff]  ;;  %v1074_v42 = vor.u32 %v1667_v17, %v1665_v16  ;;  %vm881_vm8 = vcmask 1047559   ;;  %p396_p1 = scmp.ge.s32.totalorder %s399_s20, 2  }
  0x56   : >> { %v422_v56 = vpack.c.bf16 %v410_v55, %v409_v54  ;;  %v412_v58 = vld [vmem:[%s1739_s9 + $0x48] sm:$0xff]  ;;  %v413_v61 = vld [vmem:[%s1739_s9 + $0x50] sm:$0xff]  ;;  %v414_v62 = vld [vmem:[%s1739_s9 + $0x58] sm:$0xff]  ;;  %v1784_v55 = vperm.slane %v1712_v38, 0  ;;  %s1142_s12 = sshll.u32 (%p396_p1), %s1524_s28, 4  ;;  %s899_s13 = sshll.u32 (%p396_p1), %s1726_s19, 4  ;;  %s900_s13 = int_to_ptr.vmem [resolvable:$true] %s899_s13 }
  0x57   : >> { %v423_v59 = vpack.c.bf16 %v412_v58, %v411_v57  ;;  %v424_v63 = vpack.c.bf16 %v414_v62, %v413_v61  ;;  %601 = vmatpush.bf16.msra.mxu1 %v1078_v41  ;;  %1144 = vmatpush.bf16.msra.mxu3 %v1078_v41  ;;  %v416_v45 = vld [vmem:[%s1739_s9 + $0x68] sm:$0xff]  ;;  %v2044_v12 = vld [vmem:[#allocation27_spill] sm:$0xff]  ;;  %v2045_v13 = vld [vmem:[#allocation28_spill] sm:$0xff]  ;;  %s898_s10 = scalar_lea.hbm (%p396_p1), %s1999_s7, %s1142_s12  ;;  %s887_s23 = scalar_lea.sflag (%p396_p1), [#allocation4], %s1614_s22 }
  0x58   : >> { %v1066_v46 = vor.u32 %v2045_v13, %v2044_v12  ;;  %v2046_v10 = vld [vmem:[#allocation25_spill] sm:$0xff]  ;;  %v2047_v11 = vld [vmem:[#allocation26_spill] sm:$0xff]  ;;  %v2048_v8 = vld [vmem:[#allocation23_spill] sm:$0xff]  ;;  %s901_s14 = sshll.u32 (%p396_p1), %s898_s10, 4  ;;  %s1390_s28 = scalar_lea.hbm (%p396_p1), %s1999_s7, 32  ;;  %s902_s14 = int_to_ptr.hbm [resolvable:$true] %s901_s14 }
  0x59   : >> { %482 = vmatpush.bf16.msra.mxu0 %v1038_v43  ;;  %v1070_v43 = vor.u32 %v1663_v15, %v1661_v14  ;;  %v1062_v48 = vor.u32 %v2047_v11, %v2046_v10  ;;  %v2049_v9 = vld [vmem:[#allocation24_spill] sm:$0xff]  ;;  %v2050_v6 = vld [vmem:[#allocation21_spill] sm:$0xff]  ;;  %v2051_v7 = vld [vmem:[#allocation22_spill] sm:$0xff]  ;;  %s1384_s21 = sshra.s32 (%p396_p1), %s902_s14, 4  ;;  %s1385_s21 = int_to_ptr.hbm [resolvable:$true] %s1384_s21 }
  0x5a   : >> { %v1058_v49 = vor.u32 %v2049_v9, %v2048_v8  ;;  %v417_v51 = vld [vmem:[%s1739_s9 + $0x70] sm:$0xff]  ;;  %v418_v52 = vld [vmem:[%s1739_s9 + $0x78] sm:$0xff]  ;;  %p1391_p9 = scmp.lt.s32.totalorder (%p396_p1), %s1385_s21, %s1999_s7 }
  0x5b   : >> { %602 = vmatpush.bf16.msra.mxu1 %v1074_v42  ;;  %1145 = vmatpush.bf16.msra.mxu3 %v1074_v42 }
  0x5d   : >> { %483 = vmatpush.bf16.msra.mxu0 %v1034_v44  ;;  %v415_v44 = vld [vmem:[%s1739_s9 + $0x60] sm:$0xff]  ;;  %s1386_s9 = scalar_lea.hbm (%p396_p1), %s1385_s21, 16 }
  0x5e   : > { %p1387_p4 = scmp.ne.s32.totalorder (%p396_p1), %s1385_s21, %s1386_s9  ;;  %p1392_p2 = scmp.lt.s32.totalorder (%p396_p1), %s1390_s28, %s1386_s9 }
  0x5f   : >> { %603 = vmatpush.bf16.msra.mxu1 %v1070_v43  ;;  %1146 = vmatpush.bf16.msra.mxu3 %v1070_v43 }
  0x60   : >> { %1043 = vmatmul.msk.bf16.vlgmr.msra.gmra.mxu0 %vm447_vm1, %v419_v47  ;;  %v425_v47 = vpack.c.bf16 %v416_v45, %v415_v44  ;;  %p1388_p8 = pnand (%p396_p1), %p1387_p4, %p1586_p7  ;;  %p1393_p10 = por (%p396_p1), %p1392_p2, %p1391_p9 }
  0x62   : > { %p1389_p11 = pneg (%p396_p1), %p1388_p8 }
  0x63   : >> { %604 = vmatpush.bf16.msra.mxu1 %v1066_v46  ;;  %1147 = vmatpush.bf16.msra.mxu3 %v1066_v46 }
  0x64   : > { %p1394_p12 = pnand (%p396_p1), %p1393_p10, %p1389_p11 }
  0x67   : >> { %605 = vmatpush.bf16.msra.mxu1 %v1062_v48  ;;  %1148 = vmatpush.bf16.msra.mxu3 %v1062_v48 }
  0x6b   : >> { %606 = vmatpush.bf16.msra.mxu1 %v1058_v49  ;;  %1149 = vmatpush.bf16.msra.mxu3 %v1058_v49 }
  0x70   : >> { %1044 = vmatmul.msk.bf16.gmra.mxu0 %vm447_vm1, %v420_v50  ;;  %v1054_v50 = vor.u32 %v2051_v7, %v2050_v6 }
  0x72   : >> { %607 = vmatpush.bf16.msra.mxu1 %v1054_v50  ;;  %1150 = vmatpush.bf16.msra.mxu3 %v1054_v50 }
  0x80   : >> { %1045 = vmatmul.msk.bf16.gmra.mxu0 %vm447_vm1, %v421_v53  ;;  %v426_v53 = vpack.c.bf16 %v418_v52, %v417_v51 }
  0x90   : >> { %1046 = vmatmul.msk.bf16.gmra.mxu0 %vm447_vm1, %v422_v56 }
  0xa0   : >> { %1047 = vmatmul.msk.bf16.gmra.mxu0 %vm447_vm1, %v423_v59 }
  0xb0   : >> { %1048 = vmatmul.msk.bf16.gmra.mxu0 %vm447_vm1, %v424_v63 }
  0xc0   : >> { %1049 = vmatmul.msk.bf16.gmra.mxu0 %vm447_vm1, %v425_v47 }
  0xd0   : >> { %1050 = vmatmul.msk.bf16.gmra.mxu0 %vm447_vm1, %v426_v53 }
  0xdd   : >> { %v485_v54 = vpop.f32.mrf.mxu0 }
  0xde   : >> { %v1787_v56 = vadd.f32 %v485_v54, %v1784_v55 }
  0xe0   : >> { %v2011_v59 = vmax.f32 %v1787_v56, 0.0 }
  0xe5   : >> { %v487_v57 = vpop.f32.mrf.mxu0 }
  0xe6   : >> { %v1790_v58 = vadd.f32 %v487_v57, %v1784_v55 }
  0xe8   : >> { %v2008_v60 = vmax.f32 %v1790_v58, 0.0 }
  0xea   : >> { %v541_v61 = vpack.c.bf16 %v2008_v60, %v2011_v59 }
  0xec   : >> { %608 = vmatmul.bf16.vlgmr.msra.gmra.mxu1 %v541_v61 }
  0xed   : >> { %v490_v62 = vpop.f32.mrf.mxu0 }
  0xee   : >> { %v1799_v63 = vadd.f32 %v490_v62, %v1784_v55 }
  0xf0   : >> { %v2005_v43 = vmax.f32 %v1799_v63, 0.0 }
  0xf5   : >> { %v492_v41 = vpop.f32.mrf.mxu0 }
  0xf6   : >> { %v1802_v42 = vadd.f32 %v492_v41, %v1784_v55 }
  0xf8   : >> { %v2004_v44 = vmax.f32 %v1802_v42, 0.0 }
  0xfa   : >> { %v542_v45 = vpack.c.bf16 %v2004_v44, %v2005_v43 }
  0xfc   : >> { %613 = vmatmul.bf16.gmra.mxu1 %v542_v45 }
  0xfd   : >> { %v495_v46 = vpop.f32.mrf.mxu0 }
  0xfe   : >> { %v1811_v47 = vadd.f32 %v495_v46, %v1784_v55 }
 0x100   : >> { %v2000_v50 = vmax.f32 %v1811_v47, 0.0 }
 0x105   : >> { %v497_v48 = vpop.f32.mrf.mxu0 }
 0x106   : >> { %v1814_v49 = vadd.f32 %v497_v48, %v1784_v55 }
 0x108   : >> { %v2001_v51 = vmax.f32 %v1814_v49, 0.0 }
 0x10a   : >> { %v543_v52 = vpack.c.bf16 %v2001_v51, %v2000_v50 }
 0x10c   : >> { %618 = vmatmul.bf16.gmra.mxu1 %v543_v52 }
 0x10d   : >> { %v500_v53 = vpop.f32.mrf.mxu0 }
 0x10e   : >> { %v1823_v54 = vadd.f32 %v500_v53, %v1784_v55 }
 0x110   : >> { %v2002_v62 = vmax.f32 %v1823_v54, 0.0 }
 0x115   : >> { %v502_v57 = vpop.f32.mrf.mxu0 }
 0x116   : >> { %v1826_v61 = vadd.f32 %v502_v57, %v1784_v55 }
 0x118   : >> { %v2003_v41 = vmax.f32 %v1826_v61, 0.0 }
 0x11a   : >> { %v544_v45 = vpack.c.bf16 %v2003_v41, %v2002_v62 }
 0x11c   : >> { %623 = vmatmul.bf16.gmra.mxu1 %v544_v45 }
 0x11d   : >> { %v505_v46 = vpop.f32.mrf.mxu0 }
 0x11e   : >> { %v1835_v48 = vadd.f32 %v505_v46, %v1784_v55 }
 0x120   : >> { %v2006_v57 = vmax.f32 %v1835_v48, 0.0 }
 0x125   : >> { %v507_v52 = vpop.f32.mrf.mxu0 }
 0x126   : >> { %v1838_v53 = vadd.f32 %v507_v52, %v1784_v55  ;;  %v1114_v52 = vor.u32 %v1707_v37, %v1705_v36 }
 0x128   : >> { %v2007_v50 = vmax.f32 %v1838_v53, 0.0  ;;  %724 = vmatpush.bf16.msra.mxu2 %v1114_v52  ;;  %1151 = vmatpush.bf16.msrb.mxu3 %v1114_v52 }
 0x12a   : >> { %v545_v51 = vpack.c.bf16 %v2007_v50, %v2006_v57  ;;  %v1106_v57 = vor.u32 %v1699_v33, %v1697_v32  ;;  %v1102_v50 = vor.u32 %v1695_v31, %v1693_v30 }
 0x12c   : >> { %628 = vmatmul.bf16.gmra.mxu1 %v545_v51 }
 0x12d   : >> { %v510_v62 = vpop.f32.mrf.mxu0 }
 0x12e   : >> { %v1847_v45 = vadd.f32 %v510_v62, %v1784_v55  ;;  %v1110_v62 = vor.u32 %v1703_v35, %v1701_v34 }
 0x130   : >> { %v2009_v44 = vmax.f32 %v1847_v45, 0.0  ;;  %725 = vmatpush.bf16.msra.mxu2 %v1110_v62  ;;  %1152 = vmatpush.bf16.msrb.mxu3 %v1110_v62 }
 0x134   : >> { %726 = vmatpush.bf16.msra.mxu2 %v1106_v57  ;;  %1153 = vmatpush.bf16.msrb.mxu3 %v1106_v57 }
 0x135   : >> { %v512_v46 = vpop.f32.mrf.mxu0 }
 0x136   : >> { %v1850_v41 = vadd.f32 %v512_v46, %v1784_v55 }
 0x138   : >> { %v2010_v43 = vmax.f32 %v1850_v41, 0.0  ;;  %727 = vmatpush.bf16.msra.mxu2 %v1102_v50  ;;  %1154 = vmatpush.bf16.msrb.mxu3 %v1102_v50  ;;  %v1094_v50 = vor.u32 %v1687_v27, %v1685_v26 }
 0x13a   : >> { %v546_v51 = vpack.c.bf16 %v2010_v43, %v2009_v44 }
 0x13c   : >> { %633 = vmatmul.bf16.gmra.mxu1 %v546_v51  ;;  %v1098_v51 = vor.u32 %v1691_v29, %v1689_v28 }
 0x13d   : >> { %v515_v46 = vpop.f32.mrf.mxu0 }
 0x13e   : >> { %v1867_v52 = vadd.f32 %v515_v46, %v1784_v55  ;;  %728 = vmatpush.bf16.msra.mxu2 %v1098_v51  ;;  %1155 = vmatpush.bf16.msrb.mxu3 %v1098_v51  ;;  %v1090_v46 = vor.u32 %v1683_v25, %v1681_v24  ;;  %v1086_v51 = vor.u32 %v1679_v23, %v1677_v22 }
 0x140   : >> { %v2013_v43 = vmax.f32 %v1867_v52, 0.0 }
 0x142   : >> { %729 = vmatpush.bf16.msra.mxu2 %v1094_v50  ;;  %1156 = vmatpush.bf16.msrb.mxu3 %v1094_v50 }
 0x145   : >> { %v517_v60 = vpop.f32.mrf.mxu0 }
 0x146   : >> { %v1870_v44 = vadd.f32 %v517_v60, %v1784_v55  ;;  %730 = vmatpush.bf16.msra.mxu2 %v1090_v46  ;;  %1157 = vmatpush.bf16.msrb.mxu3 %v1090_v46 }
 0x148   : >> { %v2012_v62 = vmax.f32 %v1870_v44, 0.0 }
 0x14a   : >> { %v547_v57 = vpack.c.bf16 %v2012_v62, %v2013_v43  ;;  %731 = vmatpush.bf16.msra.mxu2 %v1086_v51  ;;  %1158 = vmatpush.bf16.msrb.mxu3 %v1086_v51 }
 0x14c   : >> { %638 = vmatmul.bf16.vlgmr.msra.gmra.mxu3 %v547_v57 }
 0x14d   : >> { %v520_v60 = vpop.f32.mrf.mxu0 }
 0x14e   : >> { %v1887_v59 = vadd.f32 %v520_v60, %v1784_v55  ;;  %v550_v60 = vperm.slane %v1717_v39, 0 }
 0x150   : >> { %v2015_v57 = vmax.f32 %v1887_v59, 0.0 }
 0x155   : >> { %v522_v0 = vpop.f32.mrf.mxu0 }
 0x156   : >> { %v1890_v62 = vadd.f32 %v522_v0, %v1784_v55 }
 0x158   : >> { %v2014_v50 = vmax.f32 %v1890_v62, 0.0 }
 0x15a   : >> { %v548_v46 = vpack.c.bf16 %v2014_v50, %v2015_v57 }
 0x15c   : >> { %643 = vmatmul.bf16.gmra.mxu3 %v548_v46 }
 0x169   : >> { %v609_v43 = vpop.f32.mrf.mxu1 }
 0x16a   : >> { %v610_v1 = vadd.f32 %v609_v43, %v550_v60 }
 0x16c   : >> { %v649_v51 = vmax.f32 %v610_v1, 0.0 }
 0x171   : >> { %v611_v2 = vpop.f32.mrf.mxu1 }
 0x172   : >> { %v612_v3 = vadd.f32 %v611_v2, %v550_v60 }
 0x174   : >> { %v650_v4 = vmax.f32 %v612_v3, 0.0 }
 0x176   : >> { %v665_v0 = vpack.c.bf16 %v650_v4, %v649_v51 }
 0x178   : >> { %732 = vmatmul.bf16.vlgmr.msra.gmra.mxu2 %v665_v0 }
 0x179   : >> { %v614_v55 = vpop.f32.mrf.mxu1 }
 0x17a   : >> { %v615_v5 = vadd.f32 %v614_v55, %v550_v60 }
 0x17c   : >> { %v651_v8 = vmax.f32 %v615_v5, 0.0 }
 0x181   : >> { %v616_v6 = vpop.f32.mrf.mxu1 }
 0x182   : >> { %v617_v7 = vadd.f32 %v616_v6, %v550_v60 }
 0x184   : >> { %v652_v9 = vmax.f32 %v617_v7, 0.0 }
 0x186   : >> { %v666_v10 = vpack.c.bf16 %v652_v9, %v651_v8 }
 0x188   : >> { %737 = vmatmul.bf16.gmra.mxu2 %v666_v10 }
 0x189   : >> { %v619_v50 = vpop.f32.mrf.mxu1 }
 0x18a   : >> { %v620_v46 = vadd.f32 %v619_v50, %v550_v60 }
 0x18c   : >> { %v653_v12 = vmax.f32 %v620_v46, 0.0 }
 0x191   : >> { %v621_v57 = vpop.f32.mrf.mxu1 }
 0x192   : >> { %v622_v11 = vadd.f32 %v621_v57, %v550_v60 }
 0x194   : >> { %v654_v43 = vmax.f32 %v622_v11, 0.0 }
 0x196   : >> { %v667_v13 = vpack.c.bf16 %v654_v43, %v653_v12 }
 0x198   : >> { %742 = vmatmul.bf16.gmra.mxu2 %v667_v13 }
 0x199   : >> { %v624_v1 = vpop.f32.mrf.mxu1 }
 0x19a   : >> { %v625_v2 = vadd.f32 %v624_v1, %v550_v60 }
 0x19c   : >> { %v655_v51 = vmax.f32 %v625_v2, 0.0 }
 0x1a1   : >> { %v626_v3 = vpop.f32.mrf.mxu1 }
 0x1a2   : >> { %v627_v4 = vadd.f32 %v626_v3, %v550_v60 }
 0x1a4   : >> { %v656_v0 = vmax.f32 %v627_v4, 0.0 }
 0x1a6   : >> { %v668_v55 = vpack.c.bf16 %v656_v0, %v655_v51 }
 0x1a8   : >> { %747 = vmatmul.bf16.gmra.mxu2 %v668_v55 }
 0x1a9   : >> { %v629_v5 = vpop.f32.mrf.mxu1 }
 0x1aa   : >> { %v630_v6 = vadd.f32 %v629_v5, %v550_v60 }
 0x1ac   : >> { %v657_v9 = vmax.f32 %v630_v6, 0.0 }
 0x1b1   : >> { %v631_v7 = vpop.f32.mrf.mxu1 }
 0x1b2   : >> { %v632_v8 = vadd.f32 %v631_v7, %v550_v60 }
 0x1b4   : >> { %v658_v10 = vmax.f32 %v632_v8, 0.0 }
 0x1b6   : >> { %v669_v50 = vpack.c.bf16 %v658_v10, %v657_v9 }
 0x1b8   : >> { %752 = vmatmul.bf16.gmra.mxu2 %v669_v50 }
 0x1b9   : >> { %v634_v57 = vpop.f32.mrf.mxu1 }
 0x1ba   : >> { %v635_v11 = vadd.f32 %v634_v57, %v550_v60 }
 0x1bc   : >> { %v659_v46 = vmax.f32 %v635_v11, 0.0 }
 0x1c1   : >> { %v636_v12 = vpop.f32.mrf.mxu1 }
 0x1c2   : >> { %v637_v13 = vadd.f32 %v636_v12, %v550_v60  ;;  %v1900_v12 = vperm.slane %v1722_v40, 0 }
 0x1c4   : >> { %v660_v43 = vmax.f32 %v637_v13, 0.0 }
 0x1c6   : >> { %v670_v1 = vpack.c.bf16 %v660_v43, %v659_v46  ;;  %v2052_v43 = vmax.f32 %v1787_v56, 0.0 }
 0x1c8   : >> { %757 = vmatmul.bf16.gmra.mxu2 %v670_v1 }
 0x1cf   : >> { %v639_v2 = vpop.f32.mrf.mxu3 }
 0x1d0   : >> { %v640_v3 = vadd.f32 %v639_v2, %v550_v60 }
 0x1d2   : >> { %v661_v0 = vmax.f32 %v640_v3, 0.0  ;;  %v2053_v3 = vmax.f32 %v1790_v58, 0.0 }
 0x1d7   : >> { %v641_v4 = vpop.f32.mrf.mxu3 }
 0x1d8   : >> { %v642_v51 = vadd.f32 %v641_v4, %v550_v60 }
 0x1da   : >> { %v662_v55 = vmax.f32 %v642_v51, 0.0 }
 0x1dc   : >> { %v671_v5 = vpack.c.bf16 %v662_v55, %v661_v0 }
 0x1de   : >> { %762 = vmatmul.bf16.vlgmr.msrb.gmra.mxu3 %v671_v5 }
 0x1df   : >> { %v644_v6 = vpop.f32.mrf.mxu3 }
 0x1e0   : >> { %v645_v7 = vadd.f32 %v644_v6, %v550_v60 }
 0x1e2   : >> { %v663_v10 = vmax.f32 %v645_v7, 0.0 }
 0x1e7   : >> { %v646_v8 = vpop.f32.mrf.mxu3 }
 0x1e8   : >> { %v647_v9 = vadd.f32 %v646_v8, %v550_v60  ;;  %v2054_v8 = vmax.f32 %v1799_v63, 0.0 }
 0x1ea   : >> { %v664_v50 = vmax.f32 %v647_v9, 0.0 }
 0x1ec   : >> { %v672_v57 = vpack.c.bf16 %v664_v50, %v663_v10  ;;  %v2055_v50 = vmax.f32 %v1802_v42, 0.0 }
 0x1ee   : >> { %767 = vmatmul.bf16.gmra.mxu3 %v672_v57 }
 0x1fb   : >> { %v733_v11 = vpop.f32.mrf.mxu2 }
 0x1fc   : >> { %v734_v13 = vadd.f32 %v733_v11, %v1900_v12 }
 0x1fe   : >> { %v773_v1 = vadd.f32 %v734_v13, %v2052_v43 }
 0x200   : >> { %v789_v60 = vmax.f32 %v773_v1, 0.0 }
 0x203   : >> { %v735_v46 = vpop.f32.mrf.mxu2 }
 0x204   : >> { %v736_v2 = vadd.f32 %v735_v46, %v1900_v12 }
 0x206   : >> { %v774_v4 = vadd.f32 %v736_v2, %v2053_v3 }
 0x208   : >> { %v790_v51 = vmax.f32 %v774_v4, 0.0 }
 0x20a   : >> { %v805_v0 = vmax.f32 %v789_v60, %v790_v51 }
 0x20b   : >> { %v738_v55 = vpop.f32.mrf.mxu2 }
 0x20c   : >> { %v739_v5 = vadd.f32 %v738_v55, %v1900_v12  ;;  %v806_v6 = vrot.slane %v805_v0, 4 }
 0x20e   : >> { %v775_v9 = vadd.f32 %v739_v5, %v2054_v8  ;;  %v807_v56 = vmax.f32 %v805_v0, %v806_v6 }
 0x210   : >> { %v791_v11 = vmax.f32 %v775_v9, 0.0  ;;  %v808_v13 = vrot.slane %v807_v56, 2 }
 0x212   : >> { %v809_v2 = vmax.f32 %v807_v56, %v808_v13 }
 0x213   : >> { %v740_v7 = vpop.f32.mrf.mxu2 }
 0x214   : >> { %v741_v10 = vadd.f32 %v740_v7, %v1900_v12  ;;  %v810_v60 = vrot.slane %v809_v2, 1 }
 0x216   : >> { %v776_v57 = vadd.f32 %v741_v10, %v2055_v50  ;;  %v811_v5 = vmax.f32 %v809_v2, %v810_v60  ;;  %v2056_v2 = vmax.f32 %v1814_v49, 0.0  ;;  %v2057_v60 = vmax.f32 %v1826_v61, 0.0 }
 0x217   : >> { %v2061_v49 = vmax.f32 %v1850_v41, 0.0  ;;  %v2062_v61 = vmax.f32 %v1835_v48, 0.0  ;;  %v2065_v41 = vmax.f32 %v1870_v44, 0.0 }
 0x218   : >> { %v792_v58 = vmax.f32 %v776_v57, 0.0 }
 0x21a   : >> { %v812_v46 = vmax.f32 %v791_v11, %v792_v58 }
 0x21b   : >> { %v743_v43 = vpop.f32.mrf.mxu2 }
 0x21c   : >> { %v813_v1 = vrot.slane %v812_v46, 4  ;;  %v744_v58 = vadd.f32 %v743_v43, %v1900_v12  ;;  %v2059_v43 = vmax.f32 %v1838_v53, 0.0 }
 0x21e   : >> { %v814_v3 = vmax.f32 %v812_v46, %v813_v1 }
 0x220   : >> { %v815_v4 = vrot.slane %v814_v3, 2 }
 0x222   : >> { %v816_v51 = vmax.f32 %v814_v3, %v815_v4 }
 0x223   : >> { %v745_v63 = vpop.f32.mrf.mxu2 }
 0x224   : >> { %v817_v55 = vrot.slane %v816_v51, 1  ;;  %v746_v50 = vadd.f32 %v745_v63, %v1900_v12  ;;  %v2058_v63 = vmax.f32 %v1811_v47, 0.0  ;;  %v2063_v47 = vmax.f32 %v1847_v45, 0.0 }
 0x226   : >> { %v818_v7 = vmax.f32 %v816_v51, %v817_v55  ;;  %v778_v3 = vadd.f32 %v746_v50, %v2056_v2 }
 0x228   : >> { %v1914_v0 = vsel %vm869_vm2, %v818_v7, %v811_v5  ;;  %v777_v5 = vadd.f32 %v744_v58, %v2058_v63 }
 0x22b   : >> { %v748_v42 = vpop.f32.mrf.mxu2 }
 0x22c   : >> { %v749_v46 = vadd.f32 %v748_v42, %v1900_v12 }
 0x233   : >> { %v750_v6 = vpop.f32.mrf.mxu2 }
 0x234   : >> { %v751_v11 = vadd.f32 %v750_v6, %v1900_v12  ;;  %v2060_v6 = vmax.f32 %v1823_v54, 0.0 }
 0x236   : >> { %v780_v51 = vadd.f32 %v751_v11, %v2057_v60 }
 0x23b   : >> { %v753_v8 = vpop.f32.mrf.mxu2 }
 0x23c   : >> { %v754_v4 = vadd.f32 %v753_v8, %v1900_v12  ;;  %v794_v8 = vmax.f32 %v778_v3, 0.0 }
 0x243   : >> { %v755_v9 = vpop.f32.mrf.mxu2 }
 0x244   : >> { %v756_v13 = vadd.f32 %v755_v9, %v1900_v12  ;;  %v779_v9 = vadd.f32 %v749_v46, %v2060_v6 }
 0x246   : >> { %v782_v7 = vadd.f32 %v756_v13, %v2059_v43  ;;  %v793_v13 = vmax.f32 %v777_v5, 0.0  ;;  %v795_v46 = vmax.f32 %v779_v9, 0.0 }
 0x248   : >> { %v798_v2 = vmax.f32 %v782_v7, 0.0  ;;  %v819_v3 = vmax.f32 %v793_v13, %v794_v8 }
 0x24a   : >> { %v820_v6 = vrot.slane %v819_v3, 4 }
 0x24b   : >> { %v758_v10 = vpop.f32.mrf.mxu2 }
 0x24c   : >> { %v759_v55 = vadd.f32 %v758_v10, %v1900_v12  ;;  %v796_v10 = vmax.f32 %v780_v51, 0.0 }
 0x24e   : >> { %v783_v58 = vadd.f32 %v759_v55, %v2063_v47 }
 0x250   : >> { %v799_v63 = vmax.f32 %v783_v58, 0.0 }
 0x253   : >> { %v760_v57 = vpop.f32.mrf.mxu2 }
 0x254   : >> { %v761_v1 = vadd.f32 %v760_v57, %v1900_v12  ;;  %v781_v57 = vadd.f32 %v754_v4, %v2062_v61  ;;  %v826_v4 = vmax.f32 %v795_v46, %v796_v10  ;;  %v2067_v46 = vmax.f32 %v1890_v62, 0.0 }
 0x256   : >> { %v784_v50 = vadd.f32 %v761_v1, %v2061_v49  ;;  %v797_v48 = vmax.f32 %v781_v57, 0.0  ;;  %v827_v7 = vrot.slane %v826_v4, 4 }
 0x258   : >> { %v800_v60 = vmax.f32 %v784_v50, 0.0  ;;  %v833_v43 = vmax.f32 %v797_v48, %v798_v2  ;;  %v828_v50 = vmax.f32 %v826_v4, %v827_v7 }
 0x25a   : >> { %v840_v55 = vmax.f32 %v799_v63, %v800_v60  ;;  %v834_v61 = vrot.slane %v833_v43, 4  ;;  %v829_v58 = vrot.slane %v828_v50, 2 }
 0x261   : >> { %v763_v56 = vpop.f32.mrf.mxu3 }
 0x262   : >> { %v764_v42 = vadd.f32 %v763_v56, %v1900_v12  ;;  %v2064_v56 = vmax.f32 %v1867_v52, 0.0  ;;  %v841_v52 = vrot.slane %v840_v55, 4 }
 0x264   : >> { %v785_v54 = vadd.f32 %v764_v42, %v2064_v56  ;;  %v821_v42 = vmax.f32 %v819_v3, %v820_v6  ;;  %v842_v8 = vmax.f32 %v840_v55, %v841_v52  ;;  %v830_v3 = vmax.f32 %v828_v50, %v829_v58 }
 0x266   : >> { %v801_v45 = vmax.f32 %v785_v54, 0.0  ;;  %v822_v57 = vrot.slane %v821_v42, 2  ;;  %v843_v54 = vrot.slane %v842_v8, 2  ;;  %v831_v6 = vrot.slane %v830_v3, 1 }
 0x268   : >> { %v832_v62 = vmax.f32 %v830_v3, %v831_v6 }
 0x269   : >> { %v765_v11 = vpop.f32.mrf.mxu3 }
 0x26a   : >> { %v766_v53 = vadd.f32 %v765_v11, %v1900_v12  ;;  %v835_v11 = vmax.f32 %v833_v43, %v834_v61 }
 0x26c   : >> { %v786_v1 = vadd.f32 %v766_v53, %v2065_v41  ;;  %v2066_v53 = vmax.f32 %v1887_v59, 0.0  ;;  %v836_v56 = vrot.slane %v835_v11, 2  ;;  %v823_v41 = vmax.f32 %v821_v42, %v822_v57 }
 0x26e   : >> { %v802_v51 = vmax.f32 %v786_v1, 0.0  ;;  %v837_v63 = vmax.f32 %v835_v11, %v836_v56 }
 0x270   : >> { %v847_v49 = vmax.f32 %v801_v45, %v802_v51  ;;  %v844_v51 = vmax.f32 %v842_v8, %v843_v54  ;;  %v824_v45 = vrot.slane %v823_v41, 1 }
 0x271   : >> { %v768_v5 = vpop.f32.mrf.mxu3 }
 0x272   : >> { %v848_v9 = vrot.slane %v847_v49, 4  ;;  %v769_v44 = vadd.f32 %v768_v5, %v1900_v12  ;;  %v825_v7 = vmax.f32 %v823_v41, %v824_v45 }
 0x274   : >> { %v849_v10 = vmax.f32 %v847_v49, %v848_v9  ;;  %v787_v13 = vadd.f32 %v769_v44, %v2066_v53  ;;  %v838_v49 = vrot.slane %v837_v63, 1  ;;  %v872_v44 = vsel %vm871_vm3, %v825_v7, %v1914_v0 }
 0x275   : >> { %v874_v8 = vsel %vm873_vm4, %v832_v62, %v872_v44 }
 0x276   : >> { %v850_v1 = vrot.slane %v849_v10, 2  ;;  %v803_v48 = vmax.f32 %v787_v13, 0.0  ;;  %v839_v42 = vmax.f32 %v837_v63, %v838_v49 }
 0x278   : >> { %v851_v55 = vmax.f32 %v849_v10, %v850_v1  ;;  %v876_v10 = vsel %vm875_vm5, %v839_v42, %v874_v8 }
 0x279   : >> { %v770_v47 = vpop.f32.mrf.mxu3 }
 0x27a   : >> { %v771_v2 = vadd.f32 %v770_v47, %v1900_v12  ;;  %v845_v12 = vrot.slane %v844_v51, 1  ;;  %v852_v61 = vrot.slane %v851_v55, 1 }
 0x27c   : >> { %v788_v60 = vadd.f32 %v771_v2, %v2067_v46  ;;  %v846_v9 = vmax.f32 %v844_v51, %v845_v12  ;;  %v853_v11 = vmax.f32 %v851_v55, %v852_v61 }
 0x27e   : >> { %v804_v4 = vmax.f32 %v788_v60, 0.0  ;;  %v878_v47 = vsel %vm877_vm6, %v846_v9, %v876_v10 }
 0x27f   : >> { %v880_v53 = vsel %vm879_vm7, %v853_v11, %v878_v47 }
 0x280   : >> { %v854_v43 = vmax.f32 %v803_v48, %v804_v4 }
 0x282   : >> { %v855_v59 = vrot.slane %v854_v43, 4 }
 0x284   : >> { %v856_v5 = vmax.f32 %v854_v43, %v855_v59 }
 0x286   : >> { %v857_v52 = vrot.slane %v856_v5, 2 }
 0x288   : >> { %v858_v50 = vmax.f32 %v856_v5, %v857_v52 }
 0x28a   : >> { %v859_v57 = vrot.slane %v858_v50, 1 }
 0x28b   : > { %398 = sbr.rel (!%p396_p1) target bundleno = 81 (0x51), region = 114 }
 0x28c   : >> { %v860_v58 = vmax.f32 %v858_v50, %v859_v57 }
 0x28e   : >> { %v882_v13 = vsel %vm881_vm8, %v860_v58, %v880_v53 }
 0x28f   : >> { %885 = vst [vmem:[%s884_s16] sm:$0xff] %v882_v13 }
 0x290   : > { %1397 = shalt.err (!%p1394_p12)
}
 0x291   : > { %s1461_s22 = smov 128   ;;  %s1462_s19 = smov 8  }
 0x292   : > { %1173 = dma.vmem_to_hbm [thread:$0]  (%p1586_p7), %s900_s13, 256, %s902_s14, %s887_s23, %s1461_s22, %s1461_s22, %s1462_s19  }
 0x293 PF: > { %s916_s12 = sand.u32 1, %s1436_s24   ;;  %p2068_p13 = scmp.ge.s32.totalorder %s1448_s27, 2 }
 0x294   : > { %s917_s30 = scalar_lea.sflag [#allocation4], %s916_s12 }
 0x295   : > { %p1190_p0 = pnand %p2068_p13, %p1538_p6 }
 0x297   : > { %p1191_p3 = pneg %p1190_p0 }
 0x299   : > { %1431 = dma.done.wait (%p1191_p3), %s917_s30, 256  }
 0x29a   : > { %1433 = vsyncadd (%p1191_p3), %s917_s30, 4294967040  ;;  %p22_p5 = scmp.ge.s32.totalorder %s1570_s11, 4   ;;  %s2069_s24 = smov %s1440_s25 }
 0x29b   : > { %s2070_s25 = smov %s1444_s26  ;;  %s2071_s26 = smov %s1582_s17 }
 0x29c   : > { %s2072_s27 = smov %s1570_s11  ;;  %24 = sbr.rel (!%p22_p5) target bundleno = 9 (0x9), region = 125 }
 0x2a1   :  { %923 = vsyncpa [#allocation3], 1 }
 0x2a2   :  { %925 = vsyncpa [#allocation3 + $0x1], 1 }
 0x2a3   :  { %926 = vsyncpa [#allocation6], 1 }
 0x2a4   :  { %927 = vsyncpa [#allocation9], 1 }
 0x2a5   :  { %928 = vsyncpa [#allocation4], 1 }
 0x2a6   :  { %930 = vsyncpa [#allocation4 + $0x1], 1 }

</bundles_post_ra>
